<compile_context>
chip_gen: v7x
topology: tpu7x:2x2x1
jax: 0.10.0
libtpu: 0.0.40
codegen_flags: <defaults>
</compile_context>

<pallas_src>
import functools

import jax
import jax.numpy as jnp
from jax.experimental import pallas as pl
from jax.experimental.pallas import tpu as pltpu


def _round_up(x: int, m: int) -> int:
    return ((x + m - 1) // m) * m


def _choose_tiles(B: int, D: int, itemsize: int):
    """Byte-budget tiler: lane-wide TN first, then TM for ~2 MiB/stream tile."""
    TN = min(_round_up(D, 128), 2048)                 # lane dim, multiple of 128
    budget_bytes = 2 * 1024 * 1024                    # ~2 MiB per-stream tile
    tm = max(8, (budget_bytes // (TN * itemsize)) // 8 * 8)
    TM = min(_round_up(B, 8), tm)                     # sublane dim, multiple of 8
    # v7x has 2 TensorCores: keep >= 2 grid steps along a parallel axis when
    # the problem size allows it (irrelevant on v5e/v6e, harmless there).
    if pl.cdiv(B, TM) == 1 and pl.cdiv(D, TN) == 1 and B > 8:
        TM = max(8, _round_up((TM + 1) // 2, 8))
    return TM, TN


def _uniform_sampler_kernel(t_ref, xT_ref, x0_ref,
                            xt_ref, xtm1_ref, eps_ref, *, delta_t):
    t = t_ref[...]                               # (TM, 1)  f32 per-row scalar
    xT = xT_ref[...].astype(jnp.float32)         # (TM, TN)
    x0 = x0_ref[...].astype(jnp.float32)         # (TM, TN)

    diff = xT - x0                               # consumed once; short live range
    x_t = x0 + t * diff                          # == X_T*t + X_0*(1-t)
    eps = jnp.float32(delta_t) * diff            # == X_t - X_{t-1} exactly
    x_tm1 = x_t - eps                            # == X_T*(t-dt) + X_0*(1-(t-dt))

    xt_ref[...] = x_t.astype(xt_ref.dtype)
    xtm1_ref[...] = x_tm1.astype(xtm1_ref.dtype)
    eps_ref[...] = eps.astype(eps_ref.dtype)


def uniform_sampler_forward(X_T, X_0, *, timesteps: int, key):
    """Pallas implementation of UniformSampler.forward.

    Returns (X_t, X_t_minus_1, epsilon, t) exactly like the PyTorch module.
    Inputs are (B, D); dtype is preserved (no wrapper up-cast).
    """
    assert X_T.shape == X_0.shape and X_T.ndim == 2
    assert X_T.dtype == X_0.dtype
    B, D = X_T.shape
    out_dtype = X_T.dtype
    in_itemsize = jnp.dtype(X_T.dtype).itemsize
    out_itemsize = jnp.dtype(out_dtype).itemsize
    delta_t = 1.0 / timesteps

    # torch.randint(1, timesteps + 1, (B,)) * delta_t  -> float32 per-sample t
    ti = jax.random.randint(key, (B,), 1, timesteps + 1)
    t = ti.astype(jnp.float32) * jnp.float32(delta_t)
    t_col = t[:, None]                                          # (B, 1)

    TM, TN = _choose_tiles(B, D, in_itemsize)
    grid = (pl.cdiv(B, TM), pl.cdiv(D, TN))
    kernel = functools.partial(_uniform_sampler_kernel, delta_t=delta_t)

    out_shape = (
        jax.ShapeDtypeStruct((B, D), out_dtype),   # X_t
        jax.ShapeDtypeStruct((B, D), out_dtype),   # X_t_minus_1
        jax.ShapeDtypeStruct((B, D), out_dtype),   # epsilon
    )

    cost = pl.CostEstimate(
        flops=5 * B * D,
        transcendentals=0,
        bytes_accessed=(2 * B * D * in_itemsize          # X_T, X_0 reads
                        + B * 4                           # t reads
                        + 3 * B * D * out_itemsize),      # X_t, X_{t-1}, eps
    )

    x_t, x_t_minus_1, epsilon = pl.pallas_call(
        kernel,
        out_shape=out_shape,
        grid=grid,
        in_specs=[
            pl.BlockSpec((TM, 1), lambda i, j: (i, 0)),    # t (per-row scalar)
            pl.BlockSpec((TM, TN), lambda i, j: (i, j)),   # X_T
            pl.BlockSpec((TM, TN), lambda i, j: (i, j)),   # X_0
        ],
        out_specs=(
            pl.BlockSpec((TM, TN), lambda i, j: (i, j)),
            pl.BlockSpec((TM, TN), lambda i, j: (i, j)),
            pl.BlockSpec((TM, TN), lambda i, j: (i, j)),
        ),
        compiler_params=pltpu.CompilerParams(
            dimension_semantics=("parallel", "parallel"),
            vmem_limit_bytes=48 << 20),
        cost_estimate=cost,
    )(t_col, X_T, X_0)

    return x_t, x_t_minus_1, epsilon, t


if __name__ == "__main__":
    key = jax.random.PRNGKey(0)
    k_xt, k_x0, k_t = jax.random.split(key, 3)

    B, D = 2, 32          # small latent: batch=2, hidden=32
    timesteps = 8

    X_T = jax.random.normal(k_xt, (B, D), dtype=jnp.float32)
    X_0 = jax.random.normal(k_x0, (B, D), dtype=jnp.float32)

    x_t, x_t_minus_1, epsilon, t = uniform_sampler_forward(
        X_T, X_0, timesteps=timesteps, key=k_t)
    jax.block_until_ready((x_t, x_t_minus_1, epsilon, t))

    # Reference check in plain JAX (same t), using the original formulation.
    delta_t = 1.0 / timesteps
    t_col = t[:, None]
    x_t_ref = X_T * t_col + X_0 * (1.0 - t_col)
    x_tm1_ref = X_T * (t_col - delta_t) + X_0 * (1.0 - (t_col - delta_t))
    eps_ref = x_t_ref - x_tm1_ref

    assert x_t.shape == (B, D) and x_t.dtype == X_T.dtype
    assert jnp.allclose(x_t, x_t_ref, atol=1e-5)
    assert jnp.allclose(x_t_minus_1, x_tm1_ref, atol=1e-5)
    assert jnp.allclose(epsilon, eps_ref, atol=1e-5)
    assert t.shape == (B,)

    print("KERNEL_OK")
</pallas_src>

<mosaic_0001>
module attributes {stable_mosaic.version = 11 : i64} {
  func.func @_uniform_sampler_kernel(%arg0: i32, %arg1: i32, %arg2: memref<8x1xf32, #tpu.memory_space<vmem>>, %arg3: memref<8x128xf32, #tpu.memory_space<vmem>>, %arg4: memref<8x128xf32, #tpu.memory_space<vmem>>, %arg5: memref<8x128xf32, #tpu.memory_space<vmem>>, %arg6: memref<8x128xf32, #tpu.memory_space<vmem>>, %arg7: memref<8x128xf32, #tpu.memory_space<vmem>>) attributes {dimension_semantics = [#tpu.dimension_semantics<parallel>, #tpu.dimension_semantics<parallel>], iteration_bounds = array<i64: 1, 1>, scalar_prefetch = 0 : i64, scratch_operands = 0 : i64, tpu.core_type = #tpu.core_type<tc>, window_params = [{transform_indices = @transform_0, window_bounds = array<i64: 8, 1>}, {transform_indices = @transform_1, window_bounds = array<i64: 8, 128>}, {transform_indices = @transform_2, window_bounds = array<i64: 8, 128>}, {transform_indices = @transform_3, window_bounds = array<i64: 8, 128>}, {transform_indices = @transform_4, window_bounds = array<i64: 8, 128>}, {transform_indices = @transform_5, window_bounds = array<i64: 8, 128>}]} {
    %c0 = arith.constant 0 : index
    %c0_0 = arith.constant 0 : index
    %0 = vector.load %arg2[%c0, %c0_0] : memref<8x1xf32, #tpu.memory_space<vmem>>, vector<8x1xf32>
    %c0_1 = arith.constant 0 : index
    %c0_2 = arith.constant 0 : index
    %1 = vector.load %arg3[%c0_1, %c0_2] : memref<8x128xf32, #tpu.memory_space<vmem>>, vector<8x128xf32>
    %c0_3 = arith.constant 0 : index
    %c0_4 = arith.constant 0 : index
    %2 = vector.load %arg4[%c0_3, %c0_4] : memref<8x128xf32, #tpu.memory_space<vmem>>, vector<8x128xf32>
    %3 = arith.subf %1, %2 : vector<8x128xf32>
    %4 = vector.broadcast %0 : vector<8x1xf32> to vector<8x128xf32>
    %5 = arith.mulf %4, %3 : vector<8x128xf32>
    %6 = arith.addf %2, %5 : vector<8x128xf32>
    %cst = arith.constant 1.250000e-01 : f32
    %7 = vector.broadcast %cst : f32 to vector<8x128xf32>
    %8 = arith.mulf %7, %3 : vector<8x128xf32>
    %9 = arith.subf %6, %8 : vector<8x128xf32>
    %c0_5 = arith.constant 0 : index
    %c0_6 = arith.constant 0 : index
    %10 = vector.load %arg5[%c0_5, %c0_6] : memref<8x128xf32, #tpu.memory_space<vmem>>, vector<8x128xf32>
    tpu.vector_store %arg5[%c0_5, %c0_6], %6 {strides = array<i32>} : memref<8x128xf32, #tpu.memory_space<vmem>>, vector<8x128xf32>,
    %c0_7 = arith.constant 0 : index
    %c0_8 = arith.constant 0 : index
    %11 = vector.load %arg6[%c0_7, %c0_8] : memref<8x128xf32, #tpu.memory_space<vmem>>, vector<8x128xf32>
    tpu.vector_store %arg6[%c0_7, %c0_8], %9 {strides = array<i32>} : memref<8x128xf32, #tpu.memory_space<vmem>>, vector<8x128xf32>,
    %c0_9 = arith.constant 0 : index
    %c0_10 = arith.constant 0 : index
    %12 = vector.load %arg7[%c0_9, %c0_10] : memref<8x128xf32, #tpu.memory_space<vmem>>, vector<8x128xf32>
    tpu.vector_store %arg7[%c0_9, %c0_10], %8 {strides = array<i32>} : memref<8x128xf32, #tpu.memory_space<vmem>>, vector<8x128xf32>,
    return
  }
  func.func @transform_0(%arg0: i32, %arg1: i32) -> (i32, i32) {
    %c0_i32 = arith.constant 0 : i32
    %c0_i32_0 = arith.constant 0 : i32
    return %arg0, %c0_i32 : i32, i32
  }
  func.func @transform_1(%arg0: i32, %arg1: i32) -> (i32, i32) {
    %c0_i32 = arith.constant 0 : i32
    return %arg0, %arg1 : i32, i32
  }
  func.func @transform_2(%arg0: i32, %arg1: i32) -> (i32, i32) {
    %c0_i32 = arith.constant 0 : i32
    return %arg0, %arg1 : i32, i32
  }
  func.func @transform_3(%arg0: i32, %arg1: i32) -> (i32, i32) {
    %c0_i32 = arith.constant 0 : i32
    return %arg0, %arg1 : i32, i32
  }
  func.func @transform_4(%arg0: i32, %arg1: i32) -> (i32, i32) {
    %c0_i32 = arith.constant 0 : i32
    return %arg0, %arg1 : i32, i32
  }
  func.func @transform_5(%arg0: i32, %arg1: i32) -> (i32, i32) {
    %c0_i32 = arith.constant 0 : i32
    return %arg0, %arg1 : i32, i32
  }
}

</mosaic_0001>

<bundles_post_ra>
// kernel: tpu_custom_call.1
= control target key start
LH: loop header
LB: loop body
LE: loop exit
PB: predicated region body
PF: predicated region fallthrough
CT: control target
= control target key end

     0   :  { %11 = vsyncpa [#allocation3], 0  ;;  %v159_v3 = vmov 0   ;;  %s249_s0 = inlined_call_operand.vmem [shape: f32[2,1], index: 0, kind: input, shape index: {}]   ;;  %s250_s1 = inlined_call_operand.vmem [shape: f32[2,32], index: 1, kind: input, shape index: {}]   ;;  %s251_s2 = inlined_call_operand.vmem [shape: f32[2,32], index: 2, kind: input, shape index: {}]   ;;  %s252_s3 = inlined_call_operand.hbm [shape: f32[2,32], index: 3, kind: output, shape index: {0}]   ;;  %s253_s4 = inlined_call_operand.hbm [shape: f32[2,32], index: 4, kind: output, shape index: {1}]   ;;  %s254_s5 = inlined_call_operand.hbm [shape: f32[2,32], index: 5, kind: output, shape index: {2}]  }
   0x1   :  { %v19_v0 = vld [vmem:[%s249_s0] sm:$0xff]  ;;  %88 = vset.pattern.permute.xlu0 %v159_v3 }
   0x2   :  { %v20_v1 = vld [vmem:[%s250_s1] sm:$0xff] }
   0x3   :  { %v21_v2 = vld [vmem:[%s251_s2] sm:$0xff] }
   0x4   :  { %v22_v4 = vsub.f32 %v20_v1, %v21_v2 }
   0x5   :  { %12 = vsyncpa [#allocation5], 0  ;;  %25 = vperm.xlu0 %88, %v19_v0  }
   0x6   :  { %v30_v5 = vmul.f32 0.125, %v22_v4 }
   0x8   :  { %34 = vst [vmem:[#allocation6] sm:$0xff] %v30_v5 }
  0x84   :  { %v26_v6 = vpop.permute.xlu0 %25 }
  0x85   :  { %v28_v7 = vmul.f32 %v26_v6, %v22_v4 }
  0x87   :  { %v29_v8 = vadd.f32 %v28_v7, %v21_v2 }
  0x89   :  { %v31_v9 = vsub.f32 %v29_v8, %v30_v5  ;;  %32 = vst [vmem:[#allocation2] sm:$0xff] %v29_v8 }
  0x8b   :  { %33 = vst [vmem:[#allocation4] sm:$0xff] %v31_v9 }
  0x8c   :  { %39 = vsyncadd [#allocation3], 96  ;;  %s160_s0 = smov [#allocation2]  }
  0x8d   :  { %s40_s1 = sshll.u32 %s160_s0, 4  ;;  %s41_s1 = int_to_ptr.vmem [resolvable:$true] %s40_s1 }
  0x8e   :  { %s89_s24 = scalar_lea.vmem %s41_s1, 32  ;;  %s93_s2 = scalar_lea.vmem %s41_s1, 128 }
  0x8f   :  { %p90_p0 = scmp.ne.s32.totalorder %s41_s1, %s89_s24  ;;  %p94_p1 = scmp.lt.s32.totalorder %s41_s1, %s41_s1 }
  0x90   :  { %p95_p2 = scmp.lt.s32.totalorder %s93_s2, %s89_s24 }
  0x92   :  { %p96_p3 = por %p95_p2, %p94_p1 }
  0x94   :  { %p97_p4 = pnand %p96_p3, %p90_p0 }
  0x96   :  { %100 = shalt.err (!%p97_p4)
}
  0x97   :  { %s101_s27 = scalar_lea.hbm %s252_s3, 32 }
  0x98   :  { %p102_p5 = scmp.ne.s32.totalorder %s252_s3, %s101_s27  ;;  %p105_p6 = scmp.lt.u32.totalorder %s101_s27, %s252_s3 }
  0x9a   :  { %p107_p7 = pnand %p105_p6, %p102_p5 }
  0x9c   :  { %110 = shalt.err (!%p107_p7)
}
  0x9d   :  { %s161_s7 = smov 32   ;;  %s162_s8 = smov 2  }
  0x9e   :  { %46 = dma.vmem_to_hbm [thread:$0]  %s41_s1, 32, %s252_s3, [#allocation3], %s161_s7, %s161_s7, %s162_s8  }
  0x9f   :  { %51 = vsyncadd [#allocation5], 96  ;;  %s163_s11 = smov [#allocation4]  }
  0xa0   :  { %s52_s12 = sshll.u32 %s163_s11, 4  ;;  %s53_s12 = int_to_ptr.vmem [resolvable:$true] %s52_s12 }
  0xa1   :  { %s111_s13 = scalar_lea.vmem %s53_s12, 32  ;;  %s115_s14 = scalar_lea.vmem %s53_s12, 128 }
  0xa2   :  { %p112_p8 = scmp.ne.s32.totalorder %s53_s12, %s111_s13  ;;  %p116_p9 = scmp.lt.s32.totalorder %s53_s12, %s53_s12 }
  0xa3   :  { %p117_p10 = scmp.lt.s32.totalorder %s115_s14, %s111_s13 }
  0xa5   :  { %p118_p11 = por %p117_p10, %p116_p9 }
  0xa7   :  { %p119_p12 = pnand %p118_p11, %p112_p8 }
  0xa9   :  { %122 = shalt.err (!%p119_p12)
}
  0xaa   :  { %s123_s17 = scalar_lea.hbm %s253_s4, 32 }
  0xab   :  { %p124_p13 = scmp.ne.s32.totalorder %s253_s4, %s123_s17  ;;  %p127_p0 = scmp.lt.u32.totalorder %s123_s17, %s253_s4 }
  0xad   :  { %p129_p1 = pnand %p127_p0, %p124_p13 }
  0xaf   :  { %132 = shalt.err (!%p129_p1)
}
  0xb0   :  { %58 = dma.vmem_to_hbm [thread:$0]  %s53_s12, 32, %s253_s4, [#allocation5], %s161_s7, %s161_s7, %s162_s8  }
  0xb1   :  { %63 = vsyncadd [#allocation5], 96  ;;  %s164_s23 = smov [#allocation6]  }
  0xb2   :  { %s64_s0 = sshll.u32 %s164_s23, 4  ;;  %s65_s0 = int_to_ptr.vmem [resolvable:$true] %s64_s0 }
  0xb3   :  { %s133_s1 = scalar_lea.vmem %s65_s0, 32  ;;  %s137_s24 = scalar_lea.vmem %s65_s0, 128 }
  0xb4   :  { %p134_p2 = scmp.ne.s32.totalorder %s65_s0, %s133_s1  ;;  %p138_p3 = scmp.lt.s32.totalorder %s65_s0, %s65_s0 }
  0xb5   :  { %p139_p4 = scmp.lt.s32.totalorder %s137_s24, %s133_s1 }
  0xb7   :  { %p140_p5 = por %p139_p4, %p138_p3 }
  0xb9   :  { %p141_p6 = pnand %p140_p5, %p134_p2 }
  0xbb   :  { %144 = shalt.err (!%p141_p6)
}
  0xbc   :  { %s145_s26 = scalar_lea.hbm %s254_s5, 32 }
  0xbd   :  { %p146_p7 = scmp.ne.s32.totalorder %s254_s5, %s145_s26  ;;  %p149_p8 = scmp.lt.u32.totalorder %s145_s26, %s254_s5 }
  0xbf   :  { %p151_p9 = pnand %p149_p8, %p146_p7 }
  0xc1   :  { %154 = shalt.err (!%p151_p9)
}
  0xc2   :  { %70 = dma.vmem_to_hbm [thread:$0]  %s65_s0, 32, %s254_s5, [#allocation5], %s161_s7, %s161_s7, %s162_s8  }
  0xc3   :  { %155 = dma.done.wait [#allocation3], 128  }
  0xc4   :  { %156 = vsyncadd [#allocation3], 4294967168 }
  0xc5   :  { %157 = dma.done.wait [#allocation5], 256  }
  0xc6   :  { %158 = vsyncadd [#allocation5], 4294967040 }
  0xc7   :  { %80 = vsyncpa [#allocation3], 1 }
  0xc8   :  { %81 = vsyncpa [#allocation5], 1 }

</bundles_post_ra>
